<compile_context>
chip_gen: v7x
topology: tpu7x:2x2x1
jax: 0.10.0
libtpu: 0.0.40
codegen_flags: <defaults>
</compile_context>

<pallas_src>
import functools
import math

import jax
import jax.numpy as jnp
from jax.experimental import pallas as pl
from jax.experimental.pallas import tpu as pltpu

LN_EPS = 1e-5          # PyTorch nn.LayerNorm default eps
_VMEM_BUDGET = 40 << 20  # target per-step footprint; limit capped at 56 MiB


def _round_up(x, m):
    return ((x + m - 1) // m) * m


def _gelu_exact(x):
    # PyTorch nn.GELU() (approximate='none'): 0.5 * x * (1 + erf(x / sqrt(2))).
    # erf via Abramowitz & Stegun 7.1.26 (|err| < 1.5e-7); the 1/(1+a) divide
    # goes to the EUP via approx reciprocal (validated well inside tolerance).
    z = x * 0.7071067811865476
    az = jnp.abs(z)
    t = pl.reciprocal(1.0 + 0.3275911 * az, approx=True)
    poly = ((((1.061405429 * t - 1.453152027) * t + 1.421413741) * t
             - 0.284496736) * t + 0.254829592) * t
    erf_abs = 1.0 - poly * jnp.exp(-az * az)
    erf = jnp.where(z >= 0.0, erf_abs, -erf_abs)
    return 0.5 * x * (1.0 + erf)


# ----------------------------- fused FFN kernel ------------------------------

def _ffn_kernel(dim, masked,
                x_ref, g_ref, b_ref, w1_ref, b1_ref, w2_ref, b2_ref,
                o_ref, xn_ref, acc_ref):
    """Grid = (row tiles [parallel], hidden tiles [arbitrary])."""
    j = pl.program_id(1)

    # --- LayerNorm(dim) once per row tile; cache bf16 xn, zero the accumulator.
    @pl.when(j == 0)
    def _():
        x = x_ref[...]                                   # (tm, Dp) f32
        mean = jnp.sum(x, axis=-1, keepdims=True) * (1.0 / dim)
        xc = x - mean
        if masked:  # only emitted when dim % 128 != 0 (padded lanes are zero)
            lane = jax.lax.broadcasted_iota(jnp.int32, x.shape, 1)
            xc = jnp.where(lane < dim, xc, 0.0)
        var = jnp.sum(xc * xc, axis=-1, keepdims=True) * (1.0 / dim)
        xn = xc * jax.lax.rsqrt(var + LN_EPS) * g_ref[...] + b_ref[...]
        xn_ref[...] = xn.astype(jnp.bfloat16)
        acc_ref[...] = jnp.zeros_like(acc_ref)

    # --- Linear(dim -> hidden tile) + bias, exact-erf GELU.
    h = jnp.dot(xn_ref[...], w1_ref[...],
                preferred_element_type=jnp.float32) + b1_ref[...]
    h = _gelu_exact(h)

    # --- Dropout(p=0.0) is the identity in this forward pass.

    # --- Linear(hidden tile -> dim): accumulate the partial product.
    acc_ref[...] += jnp.dot(h.astype(jnp.bfloat16), w2_ref[...],
                            preferred_element_type=jnp.float32)

    # --- Last hidden tile: add the output bias and store.
    @pl.when(j == pl.num_programs(1) - 1)
    def _():
        o_ref[...] = acc_ref[...] + b2_ref[...]


# ------------------------------- host wrappers --------------------------------

def pack_params(params):
    """One-time weight pre-pack (do OUTSIDE the jitted forward): transpose
    PyTorch (out,in) Linear weights to (in,out), pad feature dims to multiples
    of 128, cast weights to bf16.  Zero padding never perturbs the math."""
    dim = params['gamma'].shape[0]
    hidden = params['b1'].shape[0]
    Dp = _round_up(dim, 128)
    Hp = _round_up(hidden, 128)
    return {
        'gamma': jnp.pad(params['gamma'].astype(jnp.float32),
                         (0, Dp - dim)).reshape(1, Dp),
        'beta': jnp.pad(params['beta'].astype(jnp.float32),
                        (0, Dp - dim)).reshape(1, Dp),
        'w1': jnp.pad(params['w1'].T.astype(jnp.bfloat16),
                      ((0, Dp - dim), (0, Hp - hidden))),
        'b1': jnp.pad(params['b1'].astype(jnp.float32),
                      (0, Hp - hidden)).reshape(1, Hp),
        'w2': jnp.pad(params['w2'].T.astype(jnp.bfloat16),
                      ((0, Hp - hidden), (0, Dp - dim))),
        'b2': jnp.pad(params['b2'].astype(jnp.float32),
                      (0, Dp - dim)).reshape(1, Dp),
    }


def _vmem_bytes(tm, th, Dp):
    db = 2                                              # default double-buffering
    weights = db * 2 * Dp * th * 2                      # W1 + W2 tiles (bf16)
    acts = db * 2 * tm * Dp * 4                         # x in + y out (f32)
    small = db * (3 * Dp + th) * 4                      # gamma/beta/b2 + b1
    scratch = tm * Dp * 2 + tm * Dp * 4                 # xn (bf16) + acc (f32)
    interm = tm * th * 4                                # h tile headroom
    return weights + acts + small + scratch + interm


def feed_forward(packed, x):
    """Fused FeedForward forward pass. x: (..., dim) f32 -> (..., dim) f32."""
    *lead, dim = x.shape
    Dp, Hp = packed['w1'].shape
    M = math.prod(lead) if lead else 1

    # Hidden tile: largest multiple of 128 <= 512 that divides Hp.
    th = min(Hp, 512)
    while Hp % th != 0:
        th -= 128

    # Row tile: start large (roofline), keep >= 2 row tiles for v7x megacore
    # when M allows, then shrink to the VMEM budget.
    tm = min(512, _round_up(M, 8))
    if M >= 16 and pl.cdiv(M, tm) < 2:
        tm = _round_up(pl.cdiv(M, 2), 8)
    while _vmem_bytes(tm, th, Dp) > _VMEM_BUDGET and tm > 8:
        tm = max(8, _round_up(tm // 2, 8))
    Mp = _round_up(M, tm)

    x2 = jnp.pad(x.reshape(M, dim).astype(jnp.float32),
                 ((0, Mp - M), (0, Dp - dim)))

    vmem_limit = int(min(max(_vmem_bytes(tm, th, Dp) * 5 // 4, 16 << 20),
                         56 << 20))
    cost = pl.CostEstimate(
        flops=4 * Mp * Dp * Hp,                              # two GEMMs
        transcendentals=2 * Mp * Hp,                          # exp + recip in GELU
        bytes_accessed=Mp * Dp * 4 * 2 + 2 * Dp * Hp * 2 + (3 * Dp + Hp) * 4)

    out = pl.pallas_call(
        functools.partial(_ffn_kernel, dim, dim != Dp),
        out_shape=jax.ShapeDtypeStruct((Mp, Dp), jnp.float32),
        grid_spec=pltpu.PrefetchScalarGridSpec(
            num_scalar_prefetch=0,
            grid=(Mp // tm, Hp // th),
            in_specs=[
                pl.BlockSpec((tm, Dp), lambda i, j: (i, 0)),   # x rows
                pl.BlockSpec((1, Dp), lambda i, j: (0, 0)),    # gamma
                pl.BlockSpec((1, Dp), lambda i, j: (0, 0)),    # beta
                pl.BlockSpec((Dp, th), lambda i, j: (0, j)),   # W1 hidden tile
                pl.BlockSpec((1, th), lambda i, j: (0, j)),    # b1 hidden tile
                pl.BlockSpec((th, Dp), lambda i, j: (j, 0)),   # W2 hidden tile
                pl.BlockSpec((1, Dp), lambda i, j: (0, 0)),    # b2
            ],
            out_specs=pl.BlockSpec((tm, Dp), lambda i, j: (i, 0)),
            scratch_shapes=[pltpu.VMEM((tm, Dp), jnp.bfloat16),  # cached xn
                            pltpu.VMEM((tm, Dp), jnp.float32)],  # GEMM2 acc
        ),
        compiler_params=pltpu.CompilerParams(
            dimension_semantics=("parallel", "arbitrary"),
            vmem_limit_bytes=vmem_limit),
        cost_estimate=cost,
    )(x2, packed['gamma'], packed['beta'], packed['w1'], packed['b1'],
      packed['w2'], packed['b2'])
    return out[:M, :dim].reshape(*lead, dim)


# ----------------------------- reference & init ------------------------------

def feed_forward_ref(params, x):
    """Pure-JAX f32 reference with exact-erf GELU (matches PyTorch)."""
    mean = jnp.mean(x, axis=-1, keepdims=True)
    var = jnp.mean((x - mean) ** 2, axis=-1, keepdims=True)
    xn = (x - mean) * jax.lax.rsqrt(var + LN_EPS) * params['gamma'] + params['beta']
    h = xn @ params['w1'].T + params['b1']
    h = 0.5 * h * (1.0 + jax.lax.erf(h * 0.7071067811865476))
    return h @ params['w2'].T + params['b2']


def init_params(key, dim, hidden):
    k = jax.random.split(key, 6)
    return {
        'gamma': 1.0 + 0.1 * jax.random.normal(k[0], (dim,), jnp.float32),
        'beta': 0.05 * jax.random.normal(k[1], (dim,), jnp.float32),
        'w1': 0.2 * jax.random.normal(k[2], (hidden, dim), jnp.float32),  # (out,in)
        'b1': 0.05 * jax.random.normal(k[3], (hidden,), jnp.float32),
        'w2': 0.2 * jax.random.normal(k[4], (dim, hidden), jnp.float32),  # (out,in)
        'b2': 0.05 * jax.random.normal(k[5], (dim,), jnp.float32),
    }


# ----------------------------------- main ------------------------------------

if __name__ == "__main__":
    key = jax.random.PRNGKey(0)
    kx, kp = jax.random.split(key)
    B, S, DIM, HIDDEN = 2, 8, 32, 64
    x = jax.random.normal(kx, (B, S, DIM), jnp.float32)
    params = init_params(kp, DIM, HIDDEN)

    packed = pack_params(params)          # one-time weight pre-pack (not per call)
    fwd = jax.jit(feed_forward)
    out = jax.block_until_ready(fwd(packed, x))

    assert out.shape == (B, S, DIM), out.shape
    assert out.dtype == jnp.float32
    assert bool(jnp.all(jnp.isfinite(out)))

    ref = feed_forward_ref(params, x)
    max_err = float(jnp.max(jnp.abs(out - ref)))
    # bf16 MXU operands with f32 accumulation + approx-recip erf -> small,
    # bounded deviation from the f32 reference.
    assert max_err < 1e-1, max_err

    print("KERNEL_OK")
</pallas_src>

<mosaic_0001>
module attributes {stable_mosaic.version = 11 : i64} {
  func.func @_ffn_kernel(%arg0: i32, %arg1: i32, %arg2: memref<8x128xf32, #tpu.memory_space<vmem>>, %arg3: memref<1x128xf32, #tpu.memory_space<vmem>>, %arg4: memref<1x128xf32, #tpu.memory_space<vmem>>, %arg5: memref<128x128xbf16, #tpu.memory_space<vmem>>, %arg6: memref<1x128xf32, #tpu.memory_space<vmem>>, %arg7: memref<128x128xbf16, #tpu.memory_space<vmem>>, %arg8: memref<1x128xf32, #tpu.memory_space<vmem>>, %arg9: memref<8x128xf32, #tpu.memory_space<vmem>>, %arg10: memref<8x128xbf16, #tpu.memory_space<vmem>>, %arg11: memref<8x128xf32, #tpu.memory_space<vmem>>) attributes {dimension_semantics = [#tpu.dimension_semantics<parallel>, #tpu.dimension_semantics<arbitrary>], iteration_bounds = array<i64: 2, 1>, scalar_prefetch = 0 : i64, scratch_operands = 2 : i64, tpu.core_type = #tpu.core_type<tc>, window_params = [{transform_indices = @transform_0, window_bounds = array<i64: 8, 128>}, {pipeline_mode = #tpu.pipeline_mode<synchronous>, transform_indices = @transform_1, window_bounds = array<i64: 1, 128>}, {pipeline_mode = #tpu.pipeline_mode<synchronous>, transform_indices = @transform_2, window_bounds = array<i64: 1, 128>}, {transform_indices = @transform_3, window_bounds = array<i64: 128, 128>}, {transform_indices = @transform_4, window_bounds = array<i64: 1, 128>}, {transform_indices = @transform_5, window_bounds = array<i64: 128, 128>}, {pipeline_mode = #tpu.pipeline_mode<synchronous>, transform_indices = @transform_6, window_bounds = array<i64: 1, 128>}, {transform_indices = @transform_7, window_bounds = array<i64: 8, 128>}]} {
    %c0_i32 = arith.constant 0 : i32
    %0 = arith.cmpi eq, %arg1, %c0_i32 : i32
    %1 = arith.extui %0 : i1 to i32
    %c0_i32_0 = arith.constant 0 : i32
    %2 = arith.cmpi ne, %1, %c0_i32_0 : i32
    scf.if %2 {
      %c0_29 = arith.constant 0 : index
      %c0_30 = arith.constant 0 : index
      %57 = vector.load %arg2[%c0_29, %c0_30] : memref<8x128xf32, #tpu.memory_space<vmem>>, vector<8x128xf32>
      %cst_31 = arith.constant dense<0.000000e+00> : vector<8xf32>
      %58 = vector.multi_reduction <add>, %57, %cst_31 [1] : vector<8x128xf32> to vector<8xf32>
      %59 = vector.shape_cast %58 : vector<8xf32> to vector<8x1xf32>
      %cst_32 = arith.constant 3.125000e-02 : f32
      %60 = vector.broadcast %cst_32 : f32 to vector<8x1xf32>
      %61 = arith.mulf %59, %60 : vector<8x1xf32>
      %62 = vector.broadcast %61 : vector<8x1xf32> to vector<8x128xf32>
      %63 = arith.subf %57, %62 : vector<8x128xf32>
      %64 = tpu.iota {dimensions = array<i32: 1>} : vector<8x128xi32>
      %c32_i32 = arith.constant 32 : i32
      %65 = vector.broadcast %c32_i32 : i32 to vector<8x128xi32>
      %66 = arith.cmpi slt, %64, %65 : vector<8x128xi32>
      %cst_33 = arith.constant 0.000000e+00 : f32
      %67 = vector.broadcast %cst_33 : f32 to vector<8x128xf32>
      %68 = arith.select %66, %63, %67 : vector<8x128xi1>, vector<8x128xf32>
      %69 = arith.mulf %68, %68 : vector<8x128xf32>
      %cst_34 = arith.constant dense<0.000000e+00> : vector<8xf32>
      %70 = vector.multi_reduction <add>, %69, %cst_34 [1] : vector<8x128xf32> to vector<8xf32>
      %71 = vector.shape_cast %70 : vector<8xf32> to vector<8x1xf32>
      %cst_35 = arith.constant 3.125000e-02 : f32
      %72 = vector.broadcast %cst_35 : f32 to vector<8x1xf32>
      %73 = arith.mulf %71, %72 : vector<8x1xf32>
      %cst_36 = arith.constant 9.99999974E-6 : f32
      %74 = vector.broadcast %cst_36 : f32 to vector<8x1xf32>
      %75 = arith.addf %73, %74 : vector<8x1xf32>
      %76 = math.rsqrt %75 : vector<8x1xf32>
      %77 = vector.broadcast %76 : vector<8x1xf32> to vector<8x128xf32>
      %78 = arith.mulf %68, %77 : vector<8x128xf32>
      %c0_37 = arith.constant 0 : index
      %c0_38 = arith.constant 0 : index
      %79 = vector.load %arg3[%c0_37, %c0_38] : memref<1x128xf32, #tpu.memory_space<vmem>>, vector<1x128xf32>
      %80 = vector.broadcast %79 : vector<1x128xf32> to vector<8x128xf32>
      %81 = arith.mulf %78, %80 : vector<8x128xf32>
      %c0_39 = arith.constant 0 : index
      %c0_40 = arith.constant 0 : index
      %82 = vector.load %arg4[%c0_39, %c0_40] : memref<1x128xf32, #tpu.memory_space<vmem>>, vector<1x128xf32>
      %83 = vector.broadcast %82 : vector<1x128xf32> to vector<8x128xf32>
      %84 = arith.addf %81, %83 : vector<8x128xf32>
      %85 = arith.truncf %84 : vector<8x128xf32> to vector<8x128xbf16>
      %c0_41 = arith.constant 0 : index
      %c0_42 = arith.constant 0 : index
      %86 = vector.load %arg10[%c0_41, %c0_42] : memref<8x128xbf16, #tpu.memory_space<vmem>>, vector<8x128xbf16>
      tpu.vector_store %arg10[%c0_41, %c0_42], %85 {strides = array<i32>} : memref<8x128xbf16, #tpu.memory_space<vmem>>, vector<8x128xbf16>,
      %cst_43 = arith.constant 0.000000e+00 : f32
      %87 = vector.broadcast %cst_43 : f32 to vector<8x128xf32>
      %c0_44 = arith.constant 0 : index
      %c0_45 = arith.constant 0 : index
      %88 = vector.load %arg11[%c0_44, %c0_45] : memref<8x128xf32, #tpu.memory_space<vmem>>, vector<8x128xf32>
      tpu.vector_store %arg11[%c0_44, %c0_45], %87 {strides = array<i32>} : memref<8x128xf32, #tpu.memory_space<vmem>>, vector<8x128xf32>,
    } else {
    }
    %c0 = arith.constant 0 : index
    %c0_1 = arith.constant 0 : index
    %3 = vector.load %arg10[%c0, %c0_1] : memref<8x128xbf16, #tpu.memory_space<vmem>>, vector<8x128xbf16>
    %c0_2 = arith.constant 0 : index
    %c0_3 = arith.constant 0 : index
    %4 = vector.load %arg5[%c0_2, %c0_3] : memref<128x128xbf16, #tpu.memory_space<vmem>>, vector<128x128xbf16>
    %cst = arith.constant dense<0.000000e+00> : vector<8x128xf32>
    %5 = tpu.matmul %3, %4, %cst {dimension_numbers = #tpu.dot_dimension_numbers<[1], [0], [0], [1], [0, 0, 1, 1], [], []>} : vector<8x128xbf16>, vector<128x128xbf16>, vector<8x128xf32> -> vector<8x128xf32>
    %c0_4 = arith.constant 0 : index
    %c0_5 = arith.constant 0 : index
    %6 = vector.load %arg6[%c0_4, %c0_5] : memref<1x128xf32, #tpu.memory_space<vmem>>, vector<1x128xf32>
    %7 = vector.broadcast %6 : vector<1x128xf32> to vector<8x128xf32>
    %8 = arith.addf %5, %7 : vector<8x128xf32>
    %cst_6 = arith.constant 0.707106769 : f32
    %9 = vector.broadcast %cst_6 : f32 to vector<8x128xf32>
    %10 = arith.mulf %8, %9 : vector<8x128xf32>
    %11 = math.absf %10 : vector<8x128xf32>
    %cst_7 = arith.constant 0.327591091 : f32
    %12 = vector.broadcast %cst_7 : f32 to vector<8x128xf32>
    %13 = arith.mulf %12, %11 : vector<8x128xf32>
    %cst_8 = arith.constant 1.000000e+00 : f32
    %14 = vector.broadcast %cst_8 : f32 to vector<8x128xf32>
    %15 = arith.addf %14, %13 : vector<8x128xf32>
    %16 = tpu.reciprocal %15 {approx = true} : vector<8x128xf32> -> vector<8x128xf32>
    %cst_9 = arith.constant 1.06140542 : f32
    %17 = vector.broadcast %cst_9 : f32 to vector<8x128xf32>
    %18 = arith.mulf %17, %16 : vector<8x128xf32>
    %cst_10 = arith.constant 1.45315206 : f32
    %19 = vector.broadcast %cst_10 : f32 to vector<8x128xf32>
    %20 = arith.subf %18, %19 : vector<8x128xf32>
    %21 = arith.mulf %20, %16 : vector<8x128xf32>
    %cst_11 = arith.constant 1.42141378 : f32
    %22 = vector.broadcast %cst_11 : f32 to vector<8x128xf32>
    %23 = arith.addf %21, %22 : vector<8x128xf32>
    %24 = arith.mulf %23, %16 : vector<8x128xf32>
    %cst_12 = arith.constant 0.284496725 : f32
    %25 = vector.broadcast %cst_12 : f32 to vector<8x128xf32>
    %26 = arith.subf %24, %25 : vector<8x128xf32>
    %27 = arith.mulf %26, %16 : vector<8x128xf32>
    %cst_13 = arith.constant 0.254829586 : f32
    %28 = vector.broadcast %cst_13 : f32 to vector<8x128xf32>
    %29 = arith.addf %27, %28 : vector<8x128xf32>
    %30 = arith.mulf %29, %16 : vector<8x128xf32>
    %cst_14 = arith.constant 0.000000e+00 : f32
    %31 = vector.broadcast %cst_14 : f32 to vector<8x128xf32>
    %32 = arith.subf %31, %11 : vector<8x128xf32>
    %33 = arith.mulf %32, %11 : vector<8x128xf32>
    %34 = math.exp %33 : vector<8x128xf32>
    %35 = arith.mulf %30, %34 : vector<8x128xf32>
    %cst_15 = arith.constant 1.000000e+00 : f32
    %36 = vector.broadcast %cst_15 : f32 to vector<8x128xf32>
    %37 = arith.subf %36, %35 : vector<8x128xf32>
    %cst_16 = arith.constant 0.000000e+00 : f32
    %38 = vector.broadcast %cst_16 : f32 to vector<8x128xf32>
    %39 = arith.cmpf oge, %10, %38 : vector<8x128xf32>
    %cst_17 = arith.constant 0.000000e+00 : f32
    %40 = vector.broadcast %cst_17 : f32 to vector<8x128xf32>
    %41 = arith.subf %40, %37 : vector<8x128xf32>
    %42 = arith.select %39, %37, %41 : vector<8x128xi1>, vector<8x128xf32>
    %cst_18 = arith.constant 5.000000e-01 : f32
    %43 = vector.broadcast %cst_18 : f32 to vector<8x128xf32>
    %44 = arith.mulf %43, %8 : vector<8x128xf32>
    %cst_19 = arith.constant 1.000000e+00 : f32
    %45 = vector.broadcast %cst_19 : f32 to vector<8x128xf32>
    %46 = arith.addf %45, %42 : vector<8x128xf32>
    %47 = arith.mulf %44, %46 : vector<8x128xf32>
    %c0_20 = arith.constant 0 : index
    %c0_21 = arith.constant 0 : index
    %48 = vector.load %arg11[%c0_20, %c0_21] : memref<8x128xf32, #tpu.memory_space<vmem>>, vector<8x128xf32>
    %49 = arith.truncf %47 : vector<8x128xf32> to vector<8x128xbf16>
    %c0_22 = arith.constant 0 : index
    %c0_23 = arith.constant 0 : index
    %50 = vector.load %arg7[%c0_22, %c0_23] : memref<128x128xbf16, #tpu.memory_space<vmem>>, vector<128x128xbf16>
    %cst_24 = arith.constant dense<0.000000e+00> : vector<8x128xf32>
    %51 = tpu.matmul %49, %50, %cst_24 {dimension_numbers = #tpu.dot_dimension_numbers<[1], [0], [0], [1], [0, 0, 1, 1], [], []>} : vector<8x128xbf16>, vector<128x128xbf16>, vector<8x128xf32> -> vector<8x128xf32>
    %52 = arith.addf %48, %51 : vector<8x128xf32>
    %c0_25 = arith.constant 0 : index
    %c0_26 = arith.constant 0 : index
    %53 = vector.load %arg11[%c0_25, %c0_26] : memref<8x128xf32, #tpu.memory_space<vmem>>, vector<8x128xf32>
    tpu.vector_store %arg11[%c0_25, %c0_26], %52 {strides = array<i32>} : memref<8x128xf32, #tpu.memory_space<vmem>>, vector<8x128xf32>,
    %c0_i32_27 = arith.constant 0 : i32
    %54 = arith.cmpi eq, %arg1, %c0_i32_27 : i32
    %55 = arith.extui %54 : i1 to i32
    %c0_i32_28 = arith.constant 0 : i32
    %56 = arith.cmpi ne, %55, %c0_i32_28 : i32
    scf.if %56 {
      %c0_29 = arith.constant 0 : index
      %c0_30 = arith.constant 0 : index
      %57 = vector.load %arg11[%c0_29, %c0_30] : memref<8x128xf32, #tpu.memory_space<vmem>>, vector<8x128xf32>
      %c0_31 = arith.constant 0 : index
      %c0_32 = arith.constant 0 : index
      %58 = vector.load %arg8[%c0_31, %c0_32] : memref<1x128xf32, #tpu.memory_space<vmem>>, vector<1x128xf32>
      %59 = vector.broadcast %58 : vector<1x128xf32> to vector<8x128xf32>
      %60 = arith.addf %57, %59 : vector<8x128xf32>
      %c0_33 = arith.constant 0 : index
      %c0_34 = arith.constant 0 : index
      %61 = vector.load %arg9[%c0_33, %c0_34] : memref<8x128xf32, #tpu.memory_space<vmem>>, vector<8x128xf32>
      tpu.vector_store %arg9[%c0_33, %c0_34], %60 {strides = array<i32>} : memref<8x128xf32, #tpu.memory_space<vmem>>, vector<8x128xf32>,
    } else {
    }
    return
  }
  func.func @transform_0(%arg0: i32, %arg1: i32) -> (i32, i32) {
    %c0_i32 = arith.constant 0 : i32
    %c0_i32_0 = arith.constant 0 : i32
    return %arg0, %c0_i32 : i32, i32
  }
  func.func @transform_1(%arg0: i32, %arg1: i32) -> (i32, i32) {
    %c0_i32 = arith.constant 0 : i32
    %c0_i32_0 = arith.constant 0 : i32
    %c0_i32_1 = arith.constant 0 : i32
    return %c0_i32, %c0_i32_0 : i32, i32
  }
  func.func @transform_2(%arg0: i32, %arg1: i32) -> (i32, i32) {
    %c0_i32 = arith.constant 0 : i32
    %c0_i32_0 = arith.constant 0 : i32
    %c0_i32_1 = arith.constant 0 : i32
    return %c0_i32, %c0_i32_0 : i32, i32
  }
  func.func @transform_3(%arg0: i32, %arg1: i32) -> (i32, i32) {
    %c0_i32 = arith.constant 0 : i32
    %c0_i32_0 = arith.constant 0 : i32
    return %c0_i32, %arg1 : i32, i32
  }
  func.func @transform_4(%arg0: i32, %arg1: i32) -> (i32, i32) {
    %c0_i32 = arith.constant 0 : i32
    %c0_i32_0 = arith.constant 0 : i32
    return %c0_i32, %arg1 : i32, i32
  }
  func.func @transform_5(%arg0: i32, %arg1: i32) -> (i32, i32) {
    %c0_i32 = arith.constant 0 : i32
    %c0_i32_0 = arith.constant 0 : i32
    return %arg1, %c0_i32 : i32, i32
  }
  func.func @transform_6(%arg0: i32, %arg1: i32) -> (i32, i32) {
    %c0_i32 = arith.constant 0 : i32
    %c0_i32_0 = arith.constant 0 : i32
    %c0_i32_1 = arith.constant 0 : i32
    return %c0_i32, %c0_i32_0 : i32, i32
  }
  func.func @transform_7(%arg0: i32, %arg1: i32) -> (i32, i32) {
    %c0_i32 = arith.constant 0 : i32
    %c0_i32_0 = arith.constant 0 : i32
    return %arg0, %c0_i32 : i32, i32
  }
}

</mosaic_0001>

<bundles_post_ra>
// kernel: feed_forward.1
= control target key start
LH: loop header
LB: loop body
LE: loop exit
PB: predicated region body
PF: predicated region fallthrough
CT: control target
= control target key end

     0   :  { %12 = vsyncpa [#allocation5], 0  ;;  %s1194_s0 = inlined_call_operand.vmem [shape: f32[16,128], index: 0, kind: input, shape index: {}]   ;;  %s1195_s1 = inlined_call_operand.vmem [shape: f32[1,128], index: 1, kind: input, shape index: {}]   ;;  %s1196_s2 = inlined_call_operand.vmem [shape: f32[1,128], index: 2, kind: input, shape index: {}]   ;;  %s1197_s3 = inlined_call_operand.hbm [shape: bf16[128,128], index: 3, kind: input, shape index: {}]   ;;  %s1198_s4 = inlined_call_operand.vmem [shape: f32[1,128], index: 4, kind: input, shape index: {}]   ;;  %s1199_s5 = inlined_call_operand.hbm [shape: bf16[128,128], index: 5, kind: input, shape index: {}]   ;;  %s1200_s6 = inlined_call_operand.vmem [shape: f32[1,128], index: 6, kind: input, shape index: {}]   ;;  %s1201_s7 = inlined_call_operand.vmem [shape: f32[16,128], index: 7, kind: output, shape index: {}]  }
   0x1   :  { %13 = vsyncpa [#allocation7], 0  ;;  %s1044_s24 = smov 0   ;;  %s1046_s25 = smov 0  }
   0x2   :  { %s1048_s26 = smov 0  }
   0x3 LB: > { %s745_s27 = sadd.s32 4294967295, %s996_s26   ;;  %s31_s28 = sadd.s32 1, %s992_s25  ;;  %s996_s26 = sphi %s1048_s26, %s19_s26   ;;  %s992_s25 = sphi %s1046_s25, %s1211_s25   ;;  %s988_s24 = sphi %s1044_s24, %s1210_s24  }
   0x4   : > { %p33_p0 = scmp.ge.s32.totalorder %s31_s28, 2  ;;  %p747_p1 = scmp.ge.s32.totalorder %s996_s26, 1 }
   0x5   : > { %p229_p2 = scmp.lt.s32.totalorder %s996_s26, 3  ;;  %p1069_p4 = scmp.eq.s32.totalorder %s745_s27, 0 }
   0x6   : > { %s1213_s28 = smov (%p33_p0, %s31_s28), 0  ;;  %s998_s8 = smov [#allocation4]  }
   0x7   : > { %p1065_p3 = pnand %p747_p1, %p229_p2  ;;  %s249_s9 = sshll.u32 %s998_s8, 4  ;;  %s250_s9 = int_to_ptr.vmem [resolvable:$true] %s249_s9 }
   0x8   : > { %s1206_s30 = scalar_select %p1069_p4, 1, 0 }
   0x9   : > { %s1205_s29 = scalar_select %p1065_p3, 1, 0 }
   0xa   : > { %p847_p5 = pneg %p1065_p3  ;;  %s999_s11 = smov [#allocation6]  }
   0xb   : > { %s271_s12 = sshll.u32 %s999_s11, 4  ;;  %s910_s15 = scalar_lea.hbm %s1197_s3, 1024  ;;  %s1081_s12 = int_to_ptr.vmem [resolvable:$true] %s271_s12 }
   0xc   : > { %p1077_p6 = pnand %p1069_p4, %p847_p5  ;;  %p911_p7 = scmp.ne.s32.totalorder %s1197_s3, %s910_s15 }
   0xd   : > { %p917_p11 = scmp.lt.u32.totalorder %s910_s15, %s1197_s3 }
   0xe   : > { %p912_p8 = pneg %p1077_p6 }
  0x10   : > { %p913_p9 = pnand %p912_p8, %p911_p7 }
  0x12   : > { %p914_p10 = pneg %p913_p9 }
  0x14   : > { %p919_p12 = pnand %p917_p11, %p914_p10 }
  0x16   : > { %922 = shalt.err (!%p919_p12)
}
  0x17   : > { %s923_s20 = scalar_lea.vmem %s250_s9, 1024  ;;  %p931_p2 = scmp.lt.s32.totalorder %s250_s9, %s250_s9 }
  0x18   : > { %p924_p13 = scmp.ne.s32.totalorder %s250_s9, %s923_s20  ;;  %p932_p5 = scmp.lt.s32.totalorder %s923_s20, %s923_s20 }
  0x1a   : > { %p926_p0 = pnand %p924_p13, %p912_p8  ;;  %p933_p4 = por %p932_p5, %p931_p2 }
  0x1c   : > { %p927_p1 = pneg %p926_p0 }
  0x1e   : > { %p934_p3 = pnand %p933_p4, %p927_p1 }
  0x20   : > { %937 = shalt.err (!%p934_p3)
}
  0x21   : > { %s1000_s21 = smov 64   ;;  %s1001_s22 = smov 4  }
  0x22   : > { %850 = dma.hbm_to_vmem [thread:$0]  (!%p1077_p6), %s1197_s3, 1024, %s250_s9, [#allocation5], %s1000_s21, %s1000_s21, %s1001_s22  }
  0x23   : > { %s938_s13 = scalar_lea.hbm %s1199_s5, 1024 }
  0x24   : > { %p939_p7 = scmp.ne.s32.totalorder %s1199_s5, %s938_s13  ;;  %p945_p9 = scmp.lt.u32.totalorder %s938_s13, %s1199_s5 }
  0x26   : > { %p941_p3 = pnand %p939_p7, %p912_p8 }
  0x28   : > { %p942_p4 = pneg %p941_p3 }
  0x2a   : > { %p947_p10 = pnand %p945_p9, %p942_p4 }
  0x2c   : > { %950 = shalt.err (!%p947_p10)
}
  0x2d   : > { %s951_s9 = scalar_lea.vmem %s1081_s12, 1024  ;;  %p959_p0 = scmp.lt.s32.totalorder %s1081_s12, %s1081_s12 }
  0x2e   : > { %p952_p11 = scmp.ne.s32.totalorder %s1081_s12, %s951_s9  ;;  %p960_p1 = scmp.lt.s32.totalorder %s951_s9, %s951_s9 }
  0x30   : > { %p954_p12 = pnand %p952_p11, %p912_p8  ;;  %p961_p2 = por %p960_p1, %p959_p0 }
  0x32   : > { %p955_p13 = pneg %p954_p12 }
  0x34   : > { %p962_p5 = pnand %p961_p2, %p955_p13 }
  0x36   : > { %965 = shalt.err (!%p962_p5)
}
  0x37   : > { %853 = dma.hbm_to_vmem [thread:$0]  (!%p1077_p6), %s1199_s5, 1024, %s1081_s12, [#allocation7], %s1000_s21, %s1000_s21, %s1001_s22  }
  0x38   : > { %p1208_p7 = scmp.ne.s32.totalorder %s1205_s29, 0 }
  0x39   : > { %p1209_p3 = scmp.ne.s32.totalorder (!%p1208_p7), %s1206_s30, 0 }
  0x3a   : > { %297 = sbr.rel (%p1208_p7) target bundleno = 875 (0x36b), region = 48 }
  0x41   : > { %979 = dma.done.wait (%p1209_p3), [#allocation5], 1024  }
  0x42   : > { %981 = vsyncadd (%p1209_p3), [#allocation5], 4294966272 }
  0x43   : > { %983 = dma.done.wait (%p1209_p3), [#allocation7], 1024  }
  0x44   : > { %985 = vsyncadd (%p1209_p3), [#allocation7], 4294966272  ;;  %p334_p8 = scmp.lt.s32.totalorder %s988_s24, 1  ;;  %v1002_v1 = vmov 0.0   ;;  %v356_v2 = vlaneseq  ;;  %v888_v9 = vld [vmem:[#allocation4] sm:$0xff]   ;;  %v889_v10 = vld [vmem:[#allocation4 + $0x8] sm:$0xff]  }
  0x45   : > { %799 = vmatprep.subr.bf16.mxu0 %v1002_v1  ;;  %819 = vmatprep.subr.bf16.mxu1 %v1002_v1  ;;  %v890_v11 = vld [vmem:[#allocation4 + $0x10] sm:$0xff]   ;;  %v891_v12 = vld [vmem:[#allocation4 + $0x18] sm:$0xff]   ;;  %v892_v13 = vld [vmem:[#allocation4 + $0x20] sm:$0xff]   ;;  %vm1003_vm1 = vmmov 0  }
  0x46   : > { %s1215_s24 = smov (!%p334_p8, %s988_s24), 1  ;;  %v357_v3 = vand.u32 127, %v356_v2  ;;  %800 = vmatpush3.bf16.msra.mxu0 %v888_v9  ;;  %v893_v14 = vld [vmem:[#allocation4 + $0x28] sm:$0xff]   ;;  %v894_v15 = vld [vmem:[#allocation4 + $0x30] sm:$0xff]   ;;  %v895_v16 = vld [vmem:[#allocation4 + $0x38] sm:$0xff]   ;;  %815 = vmatprep.mubr.msk.bf16.mxu0 %vm1003_vm1, %v1002_v1 }
  0x47   : > { %s755_s29 = sshll.u32 %s1215_s24, 3  ;;  %801 = vmatprep.subr.bf16.mxu0 %v1002_v1  ;;  %835 = vmatprep.mubr.msk.bf16.mxu1 %vm1003_vm1, %v1002_v1  ;;  %v757_v21 = vld [vmem:[%s1195_s1] ss:$0 sm:$0xff]  ;;  %v896_v28 = vld [vmem:[#allocation6] sm:$0xff]   ;;  %v897_v29 = vld [vmem:[#allocation6 + $0x8] sm:$0xff]  }
  0x48   : > { %s337_s20 = scalar_lea.vmem %s1194_s0, %s755_s29  ;;  %vm358_vm0 = vcmp.lt.s32.totalorder %v357_v3, 32  ;;  %v758_v23 = vld [vmem:[%s1196_s2] ss:$0 sm:$0xff]  ;;  %820 = vmatpush3.bf16.msra.mxu1 %v896_v28  ;;  %v898_v30 = vld [vmem:[#allocation6 + $0x10] sm:$0xff]   ;;  %v900_v32 = vld [vmem:[#allocation6 + $0x20] sm:$0xff]   ;;  %s345_s16 = scalar_lea.vmem %s1201_s7, %s755_s29 }
  0x49   : > { %v351_v0 = vld [vmem:[%s337_s20] sm:$0xff]  ;;  %821 = vmatprep.subr.bf16.mxu1 %v1002_v1  ;;  %v901_v33 = vld [vmem:[#allocation6 + $0x28] sm:$0xff]   ;;  %v902_v34 = vld [vmem:[#allocation6 + $0x30] sm:$0xff]  }
  0x4a   : > { %352 = vadd.xlane.f32.xlu0 %v351_v0  ;;  %802 = vmatpush3.bf16.msra.mxu0 %v889_v10  ;;  %v899_v31 = vld [vmem:[#allocation6 + $0x18] sm:$0xff]  }
  0x4b   : > { %803 = vmatprep.subr.bf16.mxu0 %v1002_v1  ;;  %v903_v35 = vld [vmem:[#allocation6 + $0x38] sm:$0xff]  }
  0x4c   : > { %822 = vmatpush3.bf16.msra.mxu1 %v897_v29  ;;  %v759_v36 = vld [vmem:[%s1198_s4] ss:$0 sm:$0xff] }
  0x4d   : > { %823 = vmatprep.subr.bf16.mxu1 %v1002_v1 }
  0x4e   : > { %804 = vmatpush3.bf16.msra.mxu0 %v890_v11 }
  0x4f   : > { %805 = vmatprep.subr.bf16.mxu0 %v1002_v1 }
  0x50   : > { %824 = vmatpush3.bf16.msra.mxu1 %v898_v30 }
  0x51   : > { %825 = vmatprep.subr.bf16.mxu1 %v1002_v1 }
  0x52   : > { %806 = vmatpush3.bf16.msra.mxu0 %v891_v12 }
  0x53   : > { %807 = vmatprep.subr.bf16.mxu0 %v1002_v1 }
  0x54   : > { %826 = vmatpush3.bf16.msra.mxu1 %v899_v31 }
  0x55   : > { %827 = vmatprep.subr.bf16.mxu1 %v1002_v1 }
  0x56   : > { %808 = vmatpush3.bf16.msra.mxu0 %v892_v13 }
  0x57   : > { %809 = vmatprep.subr.bf16.mxu0 %v1002_v1 }
  0x58   : > { %828 = vmatpush3.bf16.msra.mxu1 %v900_v32 }
  0x59   : > { %829 = vmatprep.subr.bf16.mxu1 %v1002_v1 }
  0x5a   : > { %810 = vmatpush3.bf16.msra.mxu0 %v893_v14 }
  0x5b   : > { %811 = vmatprep.subr.bf16.mxu0 %v1002_v1 }
  0x5c   : > { %830 = vmatpush3.bf16.msra.mxu1 %v901_v33 }
  0x5d   : > { %831 = vmatprep.subr.bf16.mxu1 %v1002_v1 }
  0x5e   : > { %812 = vmatpush3.bf16.msra.mxu0 %v894_v15 }
  0x5f   : > { %813 = vmatprep.subr.bf16.mxu0 %v1002_v1 }
  0x60   : > { %832 = vmatpush3.bf16.msra.mxu1 %v902_v34 }
  0x61   : > { %833 = vmatprep.subr.bf16.mxu1 %v1002_v1 }
  0x62   : > { %814 = vmatpush3.bf16.msra.mxu0 %v895_v16 }
  0x64   : > { %834 = vmatpush3.bf16.msra.mxu1 %v903_v35 }
  0xd7   : > { %v353_v4 = vpop.xlane.xlu0 %352 }
  0xd8   : > { %v354_v5 = vmul.f32 0.03125, %v353_v4  ;;  %v778_v4 = vld [vmem:[%s1200_s6] ss:$0 sm:$0xff] }
  0xda   : > { %v355_v6 = vsub.f32 %v351_v0, %v354_v5 }
  0xdc   : > { %v359_v7 = vsel %vm358_vm0, %v355_v6, 0.0 }
  0xdd   : > { %v360_v8 = vmul.f32 %v359_v7, %v359_v7 }
  0xdf   : > { %361 = vadd.xlane.f32.xlu0 %v360_v8 }
 0x16c   : > { %v362_v17 = vpop.xlane.xlu0 %361 }
 0x16d   : > { %v363_v18 = vmul.f32 0.03125, %v362_v17 }
 0x16f   : > { %v364_v19 = vadd.f32 1e-05, %v363_v18 }
 0x171   : > { %904 = vrsqrt.f32 %v364_v19 }
 0x17b   : > { %v905_v20 = vpop.eup %904 }
 0x17c   : > { %v366_v22 = vmul.f32 %v905_v20, %v359_v7 }
 0x17e   : > { %v374_v24 = vmul.f32 %v757_v21, %v366_v22 }
 0x180   : > { %v382_v25 = vadd.f32 %v758_v23, %v374_v24 }
 0x182   : > { %v383_v26 = vpack.c.bf16 %v382_v25, %v382_v25 }
 0x184   : > { %384 = vst [vmem:[#allocation2] sm:$0xf] %v383_v26 }
 0x18b   : > { %v386_v27 = vld [vmem:[#allocation2] sm:$0xf] }
 0x18c   : > { %816 = vmatmul.mubr.bf16.vlgmr.msra.gmra.mrb[0].mxu0 %v386_v27 }
 0x25f   : > { %v492_v37 = vpop.f32.mrb[0].mxu0 }
 0x260   : > { %v493_v38 = vadd.f32 %v759_v36, %v492_v37  ;;  %v817_v39 = vpop.f32.mrb[1].mxu0 }
 0x261   : > { %v495_v40 = vpop.f32.mrb[2].mxu0 }
 0x262   : > { %v498_v41 = vmul.f32 0.70710677, %v493_v38  ;;  %v818_v42 = vpop.f32.mrb[3].mxu0  ;;  %v521_v0 = vmul.f32 0.5, %v493_v38 }
 0x264   : > { %v499_v43 = vand.u32 2147483647, %v498_v41  ;;  %vm518_vm2 = vcmp.ge.f32.partialorder %v498_v41, 0.0 }
 0x266   : > { %v500_v44 = vmul.f32 0.3275911, %v499_v43  ;;  %v512_v46 = vsub.f32 0.0, %v499_v43 }
 0x268   : > { %v501_v45 = vadd.f32 1.0, %v500_v44  ;;  %v513_v48 = vmul.f32 %v512_v46, %v499_v43 }
 0x26a   : > { %906 = vrcp.f32 %v501_v45  ;;  %v514_v51 = vmul.f32 1.442695, %v513_v48 }
 0x26c   : > { %908 = vpow2.f32 %v514_v51 }
 0x274   : > { %v907_v47 = vpop.eup %906 }
 0x275   : > { %v503_v49 = vmul.f32 1.0614054, %v907_v47 }
 0x276   : > { %v909_v59 = vpop.eup %908 }
 0x277   : > { %v768_v50 = vadd.f32 -1.4531521, %v503_v49 }
 0x279   : > { %v505_v52 = vmul.f32 %v907_v47, %v768_v50 }
 0x27b   : > { %v506_v53 = vadd.f32 1.4214138, %v505_v52 }
 0x27d   : > { %v507_v54 = vmul.f32 %v907_v47, %v506_v53 }
 0x27f   : > { %v769_v55 = vadd.f32 -0.28449672, %v507_v54 }
 0x281   : > { %v509_v56 = vmul.f32 %v907_v47, %v769_v55 }
 0x283   : > { %v510_v57 = vadd.f32 0.2548296, %v509_v56 }
 0x285   : > { %v511_v58 = vmul.f32 %v907_v47, %v510_v57 }
 0x287   : > { %v516_v60 = vmul.f32 %v909_v59, %v511_v58 }
 0x289   : > { %v517_v61 = vsub.f32 1.0, %v516_v60 }
 0x28b   : > { %v519_v62 = vsub.f32 0.0, %v517_v61 }
 0x28d   : > { %v520_v63 = vsel %vm518_vm2, %v517_v61, %v519_v62 }
 0x28e   : > { %v522_v1 = vadd.f32 1.0, %v520_v63 }
 0x290   : > { %v523_v2 = vmul.f32 %v522_v1, %v521_v0 }
 0x292   : > { %v525_v3 = vpack.c.bf16 %v523_v2, %v523_v2 }
 0x294   : > { %836 = vmatmul.mubr.bf16.vlgmr.msra.gmra.mrb[0].mxu1 %v525_v3 }
 0x367   : > { %v624_v5 = vpop.f32.mrb[0].mxu1 }
 0x368   : > { %v643_v6 = vadd.f32 %v778_v4, %v624_v5  ;;  %v837_v7 = vpop.f32.mrb[1].mxu1 }
 0x369   : > { %v627_v8 = vpop.f32.mrb[2].mxu1 }
 0x36a   : > { %644 = vst [vmem:[%s345_s16] sm:$0xff] %v643_v6  ;;  %v838_v9 = vpop.f32.mrb[3].mxu1 }
 0x36b PF: > { %s19_s26 = sadd.s32 1, %s996_s26   ;;  %s1210_s24 = smov %s992_s25 }
 0x36c   : > { %p16_p6 = scmp.ge.s32.totalorder %s19_s26, 4   ;;  %s1211_s25 = smov %s1213_s28 }
 0x36e   :  { %18 = sbr.rel (!%p16_p6) target bundleno = 3 (0x3), region = 100 }
 0x375   :  { %664 = vsyncpa [#allocation5], 1 }
 0x376   :  { %666 = vsyncpa [#allocation5 + $0x1], 1 }
 0x377   :  { %667 = vsyncpa [#allocation7], 1 }

</bundles_post_ra>
